<compile_context>
chip_gen: v6e
topology: v6e:2x2x1
jax: 0.10.0
libtpu: 0.0.40
codegen_flags: <defaults>
</compile_context>

<pallas_src>
import functools

import jax
import jax.numpy as jnp
from jax.experimental import pallas as pl
from jax.experimental.pallas import tpu as pltpu

OUT_PAD = 128  # lane-dense padded output width (Q1 in col 0, Q2 in col 1)


# ----------------------------------------------------------------------------
# Kernel
# ----------------------------------------------------------------------------
def _sac_critic_kernel(n_layers, obs_ref, act_ref, *refs):
    """refs = [W0_obs, W0_act, b0, (W_l, b_l) for l=1..n_layers-1, W_out, b_out, out_ref].

    All weights are fused Q1||Q2 (block-diagonal); the output weight/bias are
    zero-padded to OUT_PAD lanes so the store is lane-dense.
    """
    out_ref = refs[-1]
    params = refs[:-1]

    w0_obs = params[0]
    w0_act = params[1]
    b0 = params[2]

    # Layer 0: split-K matmul replaces the obs/action concat.
    h = (jnp.dot(obs_ref[...], w0_obs[...], preferred_element_type=jnp.float32)
         + jnp.dot(act_ref[...], w0_act[...], preferred_element_type=jnp.float32)
         + b0[...])
    h = jnp.maximum(h, 0.0)

    # Hidden layers 1..n_layers-1 (block-diagonal fused Q1/Q2).
    idx = 3
    for _ in range(n_layers - 1):
        w = params[idx][...]
        b = params[idx + 1][...]
        idx += 2
        h = jnp.maximum(
            jnp.dot(h, w, preferred_element_type=jnp.float32) + b, 0.0)

    # Output layer (identity activation), lane-padded to OUT_PAD columns.
    w_out = params[idx][...]
    b_out = params[idx + 1][...]
    out_ref[...] = (jnp.dot(h, w_out, preferred_element_type=jnp.float32)
                    + b_out).astype(out_ref.dtype)


# ----------------------------------------------------------------------------
# Parameter fusion (Q1 || Q2 -> one block-diagonal MLP)
# ----------------------------------------------------------------------------
def _block_diag2(a, b):
    z_tr = jnp.zeros((a.shape[0], b.shape[1]), a.dtype)
    z_bl = jnp.zeros((b.shape[0], a.shape[1]), a.dtype)
    top = jnp.concatenate([a, z_tr], axis=1)
    bot = jnp.concatenate([z_bl, b], axis=1)
    return jnp.concatenate([top, bot], axis=0)


def fuse_q_params(q1_params, q2_params, ob_dim, n_layers, out_pad=OUT_PAD):
    """q*_params: flat [W0, b0, ..., W_out, b_out] with W (in,out), b (1,out)."""
    fused = []
    # Layer 0: hstack the two weight matrices, then split rows by obs/action.
    w0 = jnp.concatenate([q1_params[0], q2_params[0]], axis=1)  # (in, 2*size)
    b0 = jnp.concatenate([q1_params[1], q2_params[1]], axis=1)  # (1, 2*size)
    fused += [w0[:ob_dim], w0[ob_dim:], b0]
    # Hidden layers: block-diagonal.
    for l in range(1, n_layers):
        w = _block_diag2(q1_params[2 * l], q2_params[2 * l])
        b = jnp.concatenate([q1_params[2 * l + 1], q2_params[2 * l + 1]], axis=1)
        fused += [w, b]
    # Output layer: block-diagonal (2*size, 2), zero-padded to out_pad lanes.
    w_out = _block_diag2(q1_params[2 * n_layers], q2_params[2 * n_layers])
    b_out = jnp.concatenate(
        [q1_params[2 * n_layers + 1], q2_params[2 * n_layers + 1]], axis=1)
    w_out = jnp.pad(w_out, ((0, 0), (0, out_pad - w_out.shape[1])))
    b_out = jnp.pad(b_out, ((0, 0), (0, out_pad - b_out.shape[1])))
    fused += [w_out, b_out]
    return fused


# ----------------------------------------------------------------------------
# Wrapper
# ----------------------------------------------------------------------------
def _round_up(x, m):
    return ((x + m - 1) // m) * m


def sac_critic_forward(obs, action, q1_params, q2_params, *, n_layers,
                       block_rows=2048):
    """Pallas implementation of SACCritic.forward.

    obs:    (n, ob_dim) float32
    action: (n, ac_dim) float32
    qX_params: flat list [W0, b0, ..., W_out, b_out]; W_l (in,out), b_l (1,out)
    returns (Q1, Q2), each (n, 1) float32
    """
    obs = obs.astype(jnp.float32)
    action = action.astype(jnp.float32)
    n, ob_dim = obs.shape
    ac_dim = action.shape[1]

    fused = fuse_q_params(q1_params, q2_params, ob_dim, n_layers)

    # Batch tile: large for pipelining, clamped (and rounded to 8) for small n.
    tb = min(block_rows, _round_up(n, 8))
    n_pad = _round_up(n, tb)
    if n_pad != n:
        obs = jnp.pad(obs, ((0, n_pad - n), (0, 0)))
        action = jnp.pad(action, ((0, n_pad - n), (0, 0)))

    grid = (n_pad // tb,)

    def const_spec(a):
        # Full-array block, same block every grid step -> stays VMEM-resident.
        return pl.BlockSpec(a.shape, lambda i: (0, 0))

    in_specs = ([pl.BlockSpec((tb, ob_dim), lambda i: (i, 0)),
                 pl.BlockSpec((tb, ac_dim), lambda i: (i, 0))]
                + [const_spec(p) for p in fused])
    out_specs = pl.BlockSpec((tb, OUT_PAD), lambda i: (i, 0))
    out_shape = jax.ShapeDtypeStruct((n_pad, OUT_PAD), jnp.float32)

    kernel = functools.partial(_sac_critic_kernel, n_layers)

    out = pl.pallas_call(
        kernel,
        out_shape=out_shape,
        grid=grid,
        in_specs=in_specs,
        out_specs=out_specs,
        compiler_params=pltpu.CompilerParams(
            dimension_semantics=("parallel",)),
    )(obs, action, *fused)

    return out[:n, 0:1], out[:n, 1:2]


# ----------------------------------------------------------------------------
# Deterministic parameter init (mimics nn.Linear default: U(+-1/sqrt(fan_in)))
# ----------------------------------------------------------------------------
def init_mlp_params(key, in_dim, out_dim, n_layers, size):
    dims = [in_dim] + [size] * n_layers + [out_dim]
    params = []
    for l in range(len(dims) - 1):
        fan_in, fan_out = dims[l], dims[l + 1]
        key, kw, kb = jax.random.split(key, 3)
        bound = 1.0 / jnp.sqrt(jnp.float32(fan_in))
        w = jax.random.uniform(kw, (fan_in, fan_out), jnp.float32, -bound, bound)
        b = jax.random.uniform(kb, (1, fan_out), jnp.float32, -bound, bound)
        params += [w, b]
    return key, params


# ----------------------------------------------------------------------------
# Pure-JAX reference for correctness check
# ----------------------------------------------------------------------------
def ref_forward(obs, action, q1_params, q2_params, n_layers):
    x = jnp.concatenate([obs, action], axis=1)

    def mlp(x, params):
        h = x
        for l in range(n_layers):
            h = jnp.maximum(h @ params[2 * l] + params[2 * l + 1], 0.0)
        return h @ params[2 * n_layers] + params[2 * n_layers + 1]

    return mlp(x, q1_params), mlp(x, q2_params)


if __name__ == "__main__":
    ob_dim = 12
    ac_dim = 4
    size = 32
    n_layers = 2

    key = jax.random.PRNGKey(0)
    key, q1_params = init_mlp_params(key, ob_dim + ac_dim, 1, n_layers, size)
    key, q2_params = init_mlp_params(key, ob_dim + ac_dim, 1, n_layers, size)

    # --- small batch (single grid step) ---
    batch = 8
    key, k_obs, k_act = jax.random.split(key, 3)
    obs = jax.random.normal(k_obs, (batch, ob_dim), jnp.float32)      # _no
    action = jax.random.normal(k_act, (batch, ac_dim), jnp.float32)   # _na

    q1, q2 = sac_critic_forward(obs, action, q1_params, q2_params,
                                n_layers=n_layers)
    jax.block_until_ready((q1, q2))
    r1, r2 = ref_forward(obs, action, q1_params, q2_params, n_layers)
    assert q1.shape == (batch, 1) and q2.shape == (batch, 1)
    assert jnp.allclose(q1, r1, atol=1e-5, rtol=1e-5)
    assert jnp.allclose(q2, r2, atol=1e-5, rtol=1e-5)

    # --- larger batch (multi-step grid + tail padding path) ---
    batch2 = 1000
    key, k_obs2, k_act2 = jax.random.split(key, 3)
    obs2 = jax.random.normal(k_obs2, (batch2, ob_dim), jnp.float32)
    action2 = jax.random.normal(k_act2, (batch2, ac_dim), jnp.float32)

    q1b, q2b = sac_critic_forward(obs2, action2, q1_params, q2_params,
                                  n_layers=n_layers, block_rows=256)
    jax.block_until_ready((q1b, q2b))
    r1b, r2b = ref_forward(obs2, action2, q1_params, q2_params, n_layers)
    assert q1b.shape == (batch2, 1) and q2b.shape == (batch2, 1)
    assert jnp.allclose(q1b, r1b, atol=1e-5, rtol=1e-5)
    assert jnp.allclose(q2b, r2b, atol=1e-5, rtol=1e-5)

    print("KERNEL_OK")
</pallas_src>

<mosaic_0001>
module attributes {stable_mosaic.version = 11 : i64} {
  func.func @_sac_critic_kernel(%arg0: i32, %arg1: memref<8x12xf32, #tpu.memory_space<vmem>>, %arg2: memref<8x4xf32, #tpu.memory_space<vmem>>, %arg3: memref<12x64xf32, #tpu.memory_space<vmem>>, %arg4: memref<4x64xf32, #tpu.memory_space<vmem>>, %arg5: memref<1x64xf32, #tpu.memory_space<vmem>>, %arg6: memref<64x64xf32, #tpu.memory_space<vmem>>, %arg7: memref<1x64xf32, #tpu.memory_space<vmem>>, %arg8: memref<64x128xf32, #tpu.memory_space<vmem>>, %arg9: memref<1x128xf32, #tpu.memory_space<vmem>>, %arg10: memref<8x128xf32, #tpu.memory_space<vmem>>) attributes {dimension_semantics = [#tpu.dimension_semantics<parallel>], iteration_bounds = array<i64: 1>, scalar_prefetch = 0 : i64, scratch_operands = 0 : i64, tpu.core_type = #tpu.core_type<tc>, window_params = [{transform_indices = @transform_0, window_bounds = array<i64: 8, 12>}, {transform_indices = @transform_1, window_bounds = array<i64: 8, 4>}, {pipeline_mode = #tpu.pipeline_mode<synchronous>, transform_indices = @transform_2, window_bounds = array<i64: 12, 64>}, {pipeline_mode = #tpu.pipeline_mode<synchronous>, transform_indices = @transform_3, window_bounds = array<i64: 4, 64>}, {pipeline_mode = #tpu.pipeline_mode<synchronous>, transform_indices = @transform_4, window_bounds = array<i64: 1, 64>}, {pipeline_mode = #tpu.pipeline_mode<synchronous>, transform_indices = @transform_5, window_bounds = array<i64: 64, 64>}, {pipeline_mode = #tpu.pipeline_mode<synchronous>, transform_indices = @transform_6, window_bounds = array<i64: 1, 64>}, {pipeline_mode = #tpu.pipeline_mode<synchronous>, transform_indices = @transform_7, window_bounds = array<i64: 64, 128>}, {pipeline_mode = #tpu.pipeline_mode<synchronous>, transform_indices = @transform_8, window_bounds = array<i64: 1, 128>}, {transform_indices = @transform_9, window_bounds = array<i64: 8, 128>}]} {
    %c0 = arith.constant 0 : index
    %c0_0 = arith.constant 0 : index
    %0 = vector.load %arg1[%c0, %c0_0] : memref<8x12xf32, #tpu.memory_space<vmem>>, vector<8x12xf32>
    %c0_1 = arith.constant 0 : index
    %c0_2 = arith.constant 0 : index
    %1 = vector.load %arg3[%c0_1, %c0_2] : memref<12x64xf32, #tpu.memory_space<vmem>>, vector<12x64xf32>
    %cst = arith.constant dense<0.000000e+00> : vector<8x64xf32>
    %2 = tpu.matmul %0, %1, %cst {dimension_numbers = #tpu.dot_dimension_numbers<[1], [0], [0], [1], [0, 0, 1, 1], [], []>} : vector<8x12xf32>, vector<12x64xf32>, vector<8x64xf32> -> vector<8x64xf32>
    %c0_3 = arith.constant 0 : index
    %c0_4 = arith.constant 0 : index
    %3 = vector.load %arg2[%c0_3, %c0_4] : memref<8x4xf32, #tpu.memory_space<vmem>>, vector<8x4xf32>
    %c0_5 = arith.constant 0 : index
    %c0_6 = arith.constant 0 : index
    %4 = vector.load %arg4[%c0_5, %c0_6] : memref<4x64xf32, #tpu.memory_space<vmem>>, vector<4x64xf32>
    %cst_7 = arith.constant dense<0.000000e+00> : vector<8x64xf32>
    %5 = tpu.matmul %3, %4, %cst_7 {dimension_numbers = #tpu.dot_dimension_numbers<[1], [0], [0], [1], [0, 0, 1, 1], [], []>} : vector<8x4xf32>, vector<4x64xf32>, vector<8x64xf32> -> vector<8x64xf32>
    %6 = arith.addf %2, %5 : vector<8x64xf32>
    %c0_8 = arith.constant 0 : index
    %c0_9 = arith.constant 0 : index
    %7 = vector.load %arg5[%c0_8, %c0_9] : memref<1x64xf32, #tpu.memory_space<vmem>>, vector<1x64xf32>
    %8 = vector.broadcast %7 : vector<1x64xf32> to vector<8x64xf32>
    %9 = arith.addf %6, %8 : vector<8x64xf32>
    %cst_10 = arith.constant 0.000000e+00 : f32
    %10 = vector.broadcast %cst_10 : f32 to vector<8x64xf32>
    %11 = arith.maximumf %9, %10 : vector<8x64xf32>
    %c0_11 = arith.constant 0 : index
    %c0_12 = arith.constant 0 : index
    %12 = vector.load %arg6[%c0_11, %c0_12] : memref<64x64xf32, #tpu.memory_space<vmem>>, vector<64x64xf32>
    %c0_13 = arith.constant 0 : index
    %c0_14 = arith.constant 0 : index
    %13 = vector.load %arg7[%c0_13, %c0_14] : memref<1x64xf32, #tpu.memory_space<vmem>>, vector<1x64xf32>
    %cst_15 = arith.constant dense<0.000000e+00> : vector<8x64xf32>
    %14 = tpu.matmul %11, %12, %cst_15 {dimension_numbers = #tpu.dot_dimension_numbers<[1], [0], [0], [1], [0, 0, 1, 1], [], []>} : vector<8x64xf32>, vector<64x64xf32>, vector<8x64xf32> -> vector<8x64xf32>
    %15 = vector.broadcast %13 : vector<1x64xf32> to vector<8x64xf32>
    %16 = arith.addf %14, %15 : vector<8x64xf32>
    %cst_16 = arith.constant 0.000000e+00 : f32
    %17 = vector.broadcast %cst_16 : f32 to vector<8x64xf32>
    %18 = arith.maximumf %16, %17 : vector<8x64xf32>
    %c0_17 = arith.constant 0 : index
    %c0_18 = arith.constant 0 : index
    %19 = vector.load %arg8[%c0_17, %c0_18] : memref<64x128xf32, #tpu.memory_space<vmem>>, vector<64x128xf32>
    %c0_19 = arith.constant 0 : index
    %c0_20 = arith.constant 0 : index
    %20 = vector.load %arg9[%c0_19, %c0_20] : memref<1x128xf32, #tpu.memory_space<vmem>>, vector<1x128xf32>
    %cst_21 = arith.constant dense<0.000000e+00> : vector<8x128xf32>
    %21 = tpu.matmul %18, %19, %cst_21 {dimension_numbers = #tpu.dot_dimension_numbers<[1], [0], [0], [1], [0, 0, 1, 1], [], []>} : vector<8x64xf32>, vector<64x128xf32>, vector<8x128xf32> -> vector<8x128xf32>
    %22 = vector.broadcast %20 : vector<1x128xf32> to vector<8x128xf32>
    %23 = arith.addf %21, %22 : vector<8x128xf32>
    %c0_22 = arith.constant 0 : index
    %c0_23 = arith.constant 0 : index
    %24 = vector.load %arg10[%c0_22, %c0_23] : memref<8x128xf32, #tpu.memory_space<vmem>>, vector<8x128xf32>
    tpu.vector_store %arg10[%c0_22, %c0_23], %23 {strides = array<i32>} : memref<8x128xf32, #tpu.memory_space<vmem>>, vector<8x128xf32>,
    return
  }
  func.func @transform_0(%arg0: i32) -> (i32, i32) {
    %c0_i32 = arith.constant 0 : i32
    %c0_i32_0 = arith.constant 0 : i32
    return %arg0, %c0_i32 : i32, i32
  }
  func.func @transform_1(%arg0: i32) -> (i32, i32) {
    %c0_i32 = arith.constant 0 : i32
    %c0_i32_0 = arith.constant 0 : i32
    return %arg0, %c0_i32 : i32, i32
  }
  func.func @transform_2(%arg0: i32) -> (i32, i32) {
    %c0_i32 = arith.constant 0 : i32
    %c0_i32_0 = arith.constant 0 : i32
    %c0_i32_1 = arith.constant 0 : i32
    return %c0_i32, %c0_i32_0 : i32, i32
  }
  func.func @transform_3(%arg0: i32) -> (i32, i32) {
    %c0_i32 = arith.constant 0 : i32
    %c0_i32_0 = arith.constant 0 : i32
    %c0_i32_1 = arith.constant 0 : i32
    return %c0_i32, %c0_i32_0 : i32, i32
  }
  func.func @transform_4(%arg0: i32) -> (i32, i32) {
    %c0_i32 = arith.constant 0 : i32
    %c0_i32_0 = arith.constant 0 : i32
    %c0_i32_1 = arith.constant 0 : i32
    return %c0_i32, %c0_i32_0 : i32, i32
  }
  func.func @transform_5(%arg0: i32) -> (i32, i32) {
    %c0_i32 = arith.constant 0 : i32
    %c0_i32_0 = arith.constant 0 : i32
    %c0_i32_1 = arith.constant 0 : i32
    return %c0_i32, %c0_i32_0 : i32, i32
  }
  func.func @transform_6(%arg0: i32) -> (i32, i32) {
    %c0_i32 = arith.constant 0 : i32
    %c0_i32_0 = arith.constant 0 : i32
    %c0_i32_1 = arith.constant 0 : i32
    return %c0_i32, %c0_i32_0 : i32, i32
  }
  func.func @transform_7(%arg0: i32) -> (i32, i32) {
    %c0_i32 = arith.constant 0 : i32
    %c0_i32_0 = arith.constant 0 : i32
    %c0_i32_1 = arith.constant 0 : i32
    return %c0_i32, %c0_i32_0 : i32, i32
  }
  func.func @transform_8(%arg0: i32) -> (i32, i32) {
    %c0_i32 = arith.constant 0 : i32
    %c0_i32_0 = arith.constant 0 : i32
    %c0_i32_1 = arith.constant 0 : i32
    return %c0_i32, %c0_i32_0 : i32, i32
  }
  func.func @transform_9(%arg0: i32) -> (i32, i32) {
    %c0_i32 = arith.constant 0 : i32
    %c0_i32_0 = arith.constant 0 : i32
    return %arg0, %c0_i32 : i32, i32
  }
}

</mosaic_0001>

<bundles_post_ra>
// kernel: tpu_custom_call.1
= control target key start
LH: loop header
LB: loop body
LE: loop exit
PB: predicated region body
PF: predicated region fallthrough
CT: control target
= control target key end

     0   :  { %14 = vsyncpa [#allocation3], 0  ;;  %s731_s0 = inlined_call_operand.vmem [shape: f32[8,12], index: 0, kind: input, shape index: {}]   ;;  %s732_s1 = inlined_call_operand.vmem [shape: f32[8,4], index: 1, kind: input, shape index: {}]   ;;  %s733_s2 = inlined_call_operand.hbm [shape: f32[12,64], index: 2, kind: input, shape index: {}]   ;;  %s734_s3 = inlined_call_operand.vmem [shape: f32[4,64], index: 3, kind: input, shape index: {}]   ;;  %s735_s4 = inlined_call_operand.vmem [shape: f32[1,64], index: 4, kind: input, shape index: {}]   ;;  %s736_s5 = inlined_call_operand.hbm [shape: f32[64,64], index: 5, kind: input, shape index: {}]   ;;  %s737_s6 = inlined_call_operand.vmem [shape: f32[1,64], index: 6, kind: input, shape index: {}]   ;;  %s738_s7 = inlined_call_operand.hbm [shape: f32[64,128], index: 7, kind: input, shape index: {}]   ;;  %s739_s8 = inlined_call_operand.vmem [shape: f32[1,128], index: 8, kind: input, shape index: {}]   ;;  %s740_s9 = inlined_call_operand.hbm [shape: f32[8,128], index: 9, kind: output, shape index: {}]  }
   0x1   :  { %15 = vsyncpa [#allocation6], 0 }
   0x2   :  { %16 = vsyncpa [#allocation4], 0  ;;  %s614_s30 = smov [#allocation5]   ;;  %s615_s11 = smov [#allocation2]  }
   0x3   :  { %s42_s10 = sshll.u32 %s614_s30, 4  ;;  %s26_s12 = sshll.u32 %s615_s11, 4  ;;  %s43_s10 = int_to_ptr.vmem [resolvable:$true] %s42_s10  ;;  %s27_s12 = int_to_ptr.vmem [resolvable:$true] %s26_s12 }
   0x4   :  { %s536_s13 = scalar_lea.vmem %s43_s10, 1024  ;;  %p541_p1 = scmp.lt.s32.totalorder %s43_s10, %s43_s10 }
   0x5   :  { %p537_p0 = scmp.ne.s32.totalorder %s43_s10, %s536_s13  ;;  %p542_p2 = scmp.lt.s32.totalorder %s536_s13, %s536_s13 }
   0x7   :  { %p543_p3 = por %p542_p2, %p541_p1 }
   0x9   :  { %p544_p4 = pnand %p543_p3, %p537_p0 }
   0xb   :  { %547 = shalt.err (!%p544_p4)
}
   0xc   :  { %s616_s14 = smov 128   ;;  %s617_s15 = smov 8  }
   0xd   :  { %48 = dma.hbm_to_vmem [thread:$0]  %s736_s5, 1024, %s43_s10, [#allocation6], %s616_s14, %s616_s14, %s617_s15  }
   0xe   :  { %s556_s18 = scalar_lea.vmem %s27_s12, 256  ;;  %p561_p6 = scmp.lt.s32.totalorder %s27_s12, %s27_s12 }
   0xf   :  { %p557_p5 = scmp.ne.s32.totalorder %s27_s12, %s556_s18  ;;  %p562_p7 = scmp.lt.s32.totalorder %s556_s18, %s556_s18 }
  0x11   :  { %p563_p8 = por %p562_p7, %p561_p6 }
  0x13   :  { %p564_p9 = pnand %p563_p8, %p557_p5 }
  0x15   :  { %567 = shalt.err (!%p564_p9)
}
  0x16   :  { %32 = dma.hbm_to_vmem [thread:$0]  %s733_s2, 256, %s27_s12, [#allocation3], %s616_s14, %s616_s14, %s617_s15  }
  0x17   :  { %s618_s21 = smov [#allocation7]  }
  0x18   :  { %s56_s22 = sshll.u32 %s618_s21, 4  ;;  %s57_s22 = int_to_ptr.vmem [resolvable:$true] %s56_s22 }
  0x19   :  { %s576_s23 = scalar_lea.vmem %s57_s22, 1024  ;;  %p581_p11 = scmp.lt.s32.totalorder %s57_s22, %s57_s22 }
  0x1a   :  { %p577_p10 = scmp.ne.s32.totalorder %s57_s22, %s576_s23  ;;  %p582_p12 = scmp.lt.s32.totalorder %s576_s23, %s576_s23 }
  0x1c   :  { %p583_p13 = por %p582_p12, %p581_p11 }
  0x1e   :  { %p584_p0 = pnand %p583_p13, %p577_p10 }
  0x20   :  { %587 = shalt.err (!%p584_p0)
}
  0x21   :  { %62 = dma.hbm_to_vmem [thread:$0]  %s738_s7, 1024, %s57_s22, [#allocation6], %s616_s14, %s616_s14, %s617_s15  }
  0x22   :  { %608 = dma.done.wait [#allocation3], 256  }
  0x23   :  { %609 = vsyncadd [#allocation3], 4294967040 }
  0x24   :  { %610 = dma.done.wait [#allocation6], 2048  }
  0x25   :  { %611 = vsyncadd [#allocation6], 4294965248  ;;  %v619_v0 = vmov 0.0   ;;  %vm620_vm0 = vmmov 0   ;;  %vm83_vm1 = vcmask 1043456   ;;  %vm79_vm2 = vcmask 31744  }
  0x26   :  { %470 = vmatprep.subr.mxu0 %v619_v0  ;;  %475 = vmatprep.subr.mxu1 %v619_v0  ;;  %v78_v1 = vld [vmem:[%s734_s3] sm:$0xf]  ;;  %v76_v2 = vld [vmem:[#allocation2 + $0x8] sm:$0xf]  ;;  %vm157_vm3 = vcmask 97280   ;;  %v248_v8 = vld [vmem:[#allocation5 + $0x28] sm:$0xff] }
  0x27   :  { %472 = vmatprep.mubr.msk.f32.mxu0 %vm620_vm0, %v619_v0  ;;  %479 = vmatprep.mubr.msk.f32.mxu1 %vm620_vm0, %v619_v0  ;;  %v77_v3 = vld [vmem:[%s732_s1] sm:$0xff]  ;;  %v250_v6 = vld [vmem:[#allocation5 + $0x38] sm:$0xff]  ;;  %v247_v9 = vld [vmem:[#allocation5 + $0x20] sm:$0xff]  ;;  %vm258_vm4 = vcmask 523264   ;;  %s621_s10 = smov [#allocation8]  }
  0x28   :  { %471 = vmatpush3.msk.msra.mxu0 %vm83_vm1, %v78_v1  ;;  %476 = vmatpush3.msk.msra.mxu1 %vm83_vm1, %v76_v2  ;;  %v75_v4 = vld [vmem:[#allocation2] sm:$0xff]  ;;  %v246_v10 = vld [vmem:[#allocation5 + $0x18] sm:$0xff]  ;;  %v244_v12 = vld [vmem:[#allocation5 + $0x8] sm:$0xff]  ;;  %s428_s11 = sshll.u32 %s621_s10, 4  ;;  %s429_s11 = int_to_ptr.vmem [resolvable:$true] %s428_s11 }
  0x29   :  { %v74_v5 = vld [vmem:[%s731_s0] sm:$0xff]  ;;  %473 = vmatmul.mubr.msk.f32.vlgmr.msra.gmra.mxu0 %vm79_vm2, %v77_v3  ;;  %477 = vmatprep.subr.mxu1 %v619_v0  ;;  %v243_v13 = vld [vmem:[#allocation5] sm:$0xff]  ;;  %v340_v14 = vld [vmem:[#allocation7 + $0x38] sm:$0xff]  ;;  %s588_s12 = scalar_lea.vmem %s429_s11, 128  ;;  %p593_p2 = scmp.lt.s32.totalorder %s429_s11, %s429_s11 }
  0x2a   :  { %478 = vmatpush3.msra.mxu1 %v75_v4  ;;  %482 = vmatprep.subr.mxu0 %v619_v0  ;;  %v249_v7 = vld [vmem:[#allocation5 + $0x30] sm:$0xff]  ;;  %v338_v16 = vld [vmem:[#allocation7 + $0x28] sm:$0xff]  ;;  %v337_v17 = vld [vmem:[#allocation7 + $0x20] sm:$0xff]  ;;  %p589_p1 = scmp.ne.s32.totalorder %s429_s11, %s588_s12  ;;  %p594_p3 = scmp.lt.s32.totalorder %s588_s12, %s588_s12 }
  0x2b   :  { %480 = vmatmul.mubr.msk.f32.vlgmr.msra.gmra.mxu1 %vm157_vm3, %v74_v5  ;;  %483 = vmatpush3.msra.mxu0 %v250_v6  ;;  %v245_v11 = vld [vmem:[#allocation5 + $0x10] sm:$0xff]  ;;  %v336_v18 = vld [vmem:[#allocation7 + $0x18] sm:$0xff]  ;;  %v334_v28 = vld [vmem:[#allocation7 + $0x8] sm:$0xff] }
  0x2c   :  { %484 = vmatprep.subr.mxu0 %v619_v0  ;;  %498 = vmatprep.mubr.msk.f32.mxu0 %vm620_vm0, %v619_v0  ;;  %v339_v15 = vld [vmem:[#allocation7 + $0x30] sm:$0xff]  ;;  %v333_v29 = vld [vmem:[#allocation7] sm:$0xff]  ;;  %p595_p4 = por %p594_p3, %p593_p2 }
  0x2d   :  { %485 = vmatpush3.msra.mxu0 %v249_v7  ;;  %501 = vmatprep.subr.mxu1 %v619_v0  ;;  %v442_v22 = vld [vmem:[%s735_s4] ss:$0 sm:$0xff] }
  0x2e   :  { %486 = vmatprep.subr.mxu0 %v619_v0  ;;  %517 = vmatprep.mubr.msk.f32.mxu1 %vm620_vm0, %v619_v0  ;;  %v335_v27 = vld [vmem:[#allocation7 + $0x10] sm:$0xff]  ;;  %p596_p5 = pnand %p595_p4, %p589_p1 }
  0x2f   :  { %487 = vmatpush3.msra.mxu0 %v248_v8  ;;  %502 = vmatpush3.msra.mxu1 %v340_v14  ;;  %v443_v30 = vld [vmem:[%s737_s6] ss:$0 sm:$0xff] }
  0x30   :  { %488 = vmatprep.subr.mxu0 %v619_v0  ;;  %503 = vmatprep.subr.mxu1 %v619_v0  ;;  %v445_v35 = vld [vmem:[%s739_s8] ss:$0 sm:$0xff] }
  0x31   :  { %489 = vmatpush3.msra.mxu0 %v247_v9  ;;  %504 = vmatpush3.msra.mxu1 %v339_v15 }
  0x32   :  { %490 = vmatprep.subr.mxu0 %v619_v0  ;;  %505 = vmatprep.subr.mxu1 %v619_v0 }
  0x33   :  { %491 = vmatpush3.msra.mxu0 %v246_v10  ;;  %506 = vmatpush3.msra.mxu1 %v338_v16 }
  0x34   :  { %492 = vmatprep.subr.mxu0 %v619_v0  ;;  %507 = vmatprep.subr.mxu1 %v619_v0 }
  0x35   :  { %493 = vmatpush3.msra.mxu0 %v245_v11  ;;  %508 = vmatpush3.msra.mxu1 %v337_v17 }
  0x36   :  { %494 = vmatprep.subr.mxu0 %v619_v0  ;;  %509 = vmatprep.subr.mxu1 %v619_v0 }
  0x37   :  { %495 = vmatpush3.msra.mxu0 %v244_v12  ;;  %510 = vmatpush3.msra.mxu1 %v336_v18 }
  0x38   :  { %496 = vmatprep.subr.mxu0 %v619_v0  ;;  %511 = vmatprep.subr.mxu1 %v619_v0 }
  0x39   :  { %497 = vmatpush3.msra.mxu0 %v243_v13  ;;  %512 = vmatpush3.msra.mxu1 %v335_v27 }
  0x3a   :  { %513 = vmatprep.subr.mxu1 %v619_v0 }
  0x3b   :  { %514 = vmatpush3.msra.mxu1 %v334_v28 }
  0x3c   :  { %515 = vmatprep.subr.mxu1 %v619_v0 }
  0x3d   :  { %516 = vmatpush3.msra.mxu1 %v333_v29 }
  0xe9   :  { %v153_v19 = vpop.f32.mrf.mxu0 }
  0xeb   :  { %v474_v20 = vpop.f32.mrf.mxu0  ;;  %v230_v21 = vpop.f32.mrf.mxu1 }
  0xec   :  { %v231_v23 = vadd.f32 %v230_v21, %v153_v19 }
  0xed   :  { %v481_v24 = vpop.f32.mrf.mxu1 }
  0xee   :  { %v241_v25 = vadd.f32 %v442_v22, %v231_v23 }
  0xf0   :  { %v242_v26 = vmax.f32 %v241_v25, 0.0 }
  0xf2   :  { %499 = vmatmul.mubr.msk.f32.vlgmr.msra.gmra.mxu0 %vm258_vm4, %v242_v26 }
 0x1b2   :  { %v328_v31 = vpop.f32.mrf.mxu0 }
 0x1b3   :  { %v329_v32 = vadd.f32 %v443_v30, %v328_v31 }
 0x1b4   :  { %v500_v33 = vpop.f32.mrf.mxu0 }
 0x1b5   :  { %v332_v34 = vmax.f32 %v329_v32, 0.0 }
 0x1b7   :  { %518 = vmatmul.mubr.msk.f32.vlgmr.msra.gmra.mxu1 %vm258_vm4, %v332_v34 }
 0x277   :  { %v417_v36 = vpop.f32.mrf.mxu1 }
 0x278   :  { %v418_v37 = vadd.f32 %v445_v35, %v417_v36 }
 0x279   :  { %v519_v38 = vpop.f32.mrf.mxu1 }
 0x27a   :  { %421 = vst [vmem:[#allocation8] sm:$0xff] %v418_v37 }
 0x27b   :  { %599 = shalt.err (!%p596_p5)
}
 0x27c   :  { %431 = dma.vmem_to_hbm [thread:$0]  %s429_s11, 128, %s740_s9, [#allocation4]  }
 0x27d   :  { %612 = dma.done.wait [#allocation4], 128  }
 0x27e   :  { %613 = vsyncadd [#allocation4], 4294967168 }
 0x27f   :  { %435 = vsyncpa [#allocation3], 1 }
 0x280   :  { %436 = vsyncpa [#allocation6], 1 }
 0x281   :  { %437 = vsyncpa [#allocation4], 1 }

</bundles_post_ra>
